<compile_context>
chip_gen: v7x
topology: tpu7x:2x2x1
jax: 0.10.0
libtpu: 0.0.40
codegen_flags: <defaults>
</compile_context>

<pallas_src>
import math
import functools

import jax
import jax.numpy as jnp
from jax.experimental import pallas as pl
from jax.experimental.pallas import tpu as pltpu

LANE = 128
SUBLANE = 8


def _round_up(x, m):
    return ((x + m - 1) // m) * m


def _nalu_stack_kernel(x_ref, wh_ref, mh_ref, g_ref, o_ref, *, num_layers, eps):
    """Fused forward of `num_layers` NALU cells.

    All refs are full arrays resident in VMEM. Weights are stacked [L, D, D]
    in [in, out] layout (pre-transposed, zero-padded), so the MXU is fed with
    no transpose/relayout, and the layer loop is statically unrolled.
    """
    x = x_ref[...]                                    # [B_pad, D]
    for l in range(num_layers):                       # static unroll (tiny L)
        wh = wh_ref[l]                                # [D, D]  (in, out)
        mh = mh_ref[l]
        gw = g_ref[l]
        # NAC effective weight, gated once per layer per forward call.
        w = jnp.tanh(wh) * jax.nn.sigmoid(mh)
        # add/sub path: a = x @ W
        a = jnp.dot(x, w, preferred_element_type=jnp.float32)
        # gate: g = sigmoid(x @ G)
        g = jax.nn.sigmoid(jnp.dot(x, gw, preferred_element_type=jnp.float32))
        # mul/div path: m = exp(log(|x| + eps) @ W)
        log_x = jnp.log(jnp.abs(x) + eps)
        m = jnp.exp(jnp.dot(log_x, w, preferred_element_type=jnp.float32))
        x = g * a + (1.0 - g) * m
    o_ref[...] = x


def nalu_forward(x, wh_t, mh_t, g_t, *, num_layers, out_dim, eps=1e-10):
    """Runs the fused NALU stack. wh_t/mh_t/g_t: [L, D, D] padded, [in,out] layout."""
    batch, in_dim = x.shape
    d_pad = wh_t.shape[1]
    b_pad = _round_up(batch, SUBLANE)

    # Lane-dense, zero-padded input slab.
    x_pad = jnp.zeros((b_pad, d_pad), jnp.float32).at[:batch, :in_dim].set(x)

    kernel = functools.partial(_nalu_stack_kernel, num_layers=num_layers, eps=eps)
    y_pad = pl.pallas_call(
        kernel,
        out_shape=jax.ShapeDtypeStruct((b_pad, d_pad), jnp.float32),
        # No grid: single invocation, whole arrays live in VMEM, no pipeline
        # prologue/epilogue, no HBM round-trips between layers.
        in_specs=[pl.BlockSpec(memory_space=pltpu.MemorySpace.VMEM)] * 4,
        out_specs=pl.BlockSpec(memory_space=pltpu.MemorySpace.VMEM),
    )(x_pad, wh_t, mh_t, g_t)

    return y_pad[:batch, :out_dim]


# ----------------------------- parameters ----------------------------------


def kaiming_uniform(key, shape, a=0.0, dtype=jnp.float32):
    """Matches torch.nn.init.kaiming_uniform_ (fan_in, leaky_relu gain)."""
    fan_in = shape[1]
    gain = math.sqrt(2.0 / (1.0 + a * a))
    bound = gain * math.sqrt(3.0 / fan_in)
    return jax.random.uniform(key, shape, dtype, minval=-bound, maxval=bound)


def init_nalu_params(key, num_layers, in_dim, hidden_dim, out_dim):
    """Per-layer (W_hat, M_hat, G), each [out_l, in_l] like the PyTorch module."""
    params = []
    for i in range(num_layers):
        li = hidden_dim if i > 0 else in_dim
        lo = hidden_dim if i < num_layers - 1 else out_dim
        key, kw, km, kg = jax.random.split(key, 4)
        w_hat = kaiming_uniform(kw, (lo, li))
        m_hat = kaiming_uniform(km, (lo, li))
        g_mat = kaiming_uniform(kg, (lo, li), a=math.sqrt(5.0))
        params.append((w_hat, m_hat, g_mat))
    return params


def pack_params(params, pad_dim):
    """Transpose to [in, out] and zero-pad into [L, pad_dim, pad_dim] stacks."""
    n_layers = len(params)
    wh = jnp.zeros((n_layers, pad_dim, pad_dim), jnp.float32)
    mh = jnp.zeros((n_layers, pad_dim, pad_dim), jnp.float32)
    gg = jnp.zeros((n_layers, pad_dim, pad_dim), jnp.float32)
    for l, (w_hat, m_hat, g_mat) in enumerate(params):
        o, i = w_hat.shape
        wh = wh.at[l, :i, :o].set(w_hat.T)
        mh = mh.at[l, :i, :o].set(m_hat.T)
        gg = gg.at[l, :i, :o].set(g_mat.T)
    return wh, mh, gg


# ----------------------------- reference ------------------------------------


def nalu_reference(x, params, eps=1e-10):
    out = x
    for w_hat, m_hat, g_mat in params:
        w = jnp.tanh(w_hat) * jax.nn.sigmoid(m_hat)
        a = out @ w.T
        g = jax.nn.sigmoid(out @ g_mat.T)
        m = jnp.exp(jnp.log(jnp.abs(out) + eps) @ w.T)
        out = g * a + (1.0 - g) * m
    return out


if __name__ == "__main__":
    num_layers, in_dim, hidden_dim, out_dim = 3, 16, 32, 8
    batch = 8

    key = jax.random.PRNGKey(0)
    key, kx = jax.random.split(key)
    # Keep magnitudes ~O(1) so the exp(log(.)) multiplicative path stays
    # well-conditioned for a tight numeric check against the reference.
    x = jax.random.uniform(kx, (batch, in_dim), jnp.float32, minval=0.5, maxval=1.5)

    params = init_nalu_params(key, num_layers, in_dim, hidden_dim, out_dim)
    pad_dim = max(_round_up(d, LANE) for d in (in_dim, hidden_dim, out_dim))
    wh_t, mh_t, g_t = pack_params(params, pad_dim)

    fwd = jax.jit(
        functools.partial(nalu_forward, num_layers=num_layers, out_dim=out_dim)
    )
    y = fwd(x, wh_t, mh_t, g_t)
    y = jax.block_until_ready(y)

    y_ref = nalu_reference(x, params)
    assert y.shape == (batch, out_dim)
    assert bool(jnp.all(jnp.isfinite(y)))
    assert jnp.allclose(y, y_ref, rtol=2e-3, atol=1e-5), "mismatch vs reference"

    print("KERNEL_OK")
</pallas_src>

<mosaic_0001>
module attributes {stable_mosaic.version = 11 : i64} {
  func.func @_nalu_stack_kernel(%arg0: memref<8x128xf32, #tpu.memory_space<vmem>>, %arg1: memref<3x128x128xf32, #tpu.memory_space<vmem>>, %arg2: memref<3x128x128xf32, #tpu.memory_space<vmem>>, %arg3: memref<3x128x128xf32, #tpu.memory_space<vmem>>, %arg4: memref<8x128xf32, #tpu.memory_space<vmem>>) attributes {dimension_semantics = [], scalar_prefetch = 0 : i64, scratch_operands = 0 : i64, tpu.core_type = #tpu.core_type<tc>} {
    %c0 = arith.constant 0 : index
    %c0_0 = arith.constant 0 : index
    %0 = vector.load %arg0[%c0, %c0_0] : memref<8x128xf32, #tpu.memory_space<vmem>>, vector<8x128xf32>
    %c0_1 = arith.constant 0 : index
    %c0_2 = arith.constant 0 : index
    %c0_3 = arith.constant 0 : index
    %1 = vector.load %arg1[%c0_1, %c0_2, %c0_3] : memref<3x128x128xf32, #tpu.memory_space<vmem>>, vector<1x128x128xf32>
    %2 = vector.shape_cast %1 : vector<1x128x128xf32> to vector<128x128xf32>
    %c0_4 = arith.constant 0 : index
    %c0_5 = arith.constant 0 : index
    %c0_6 = arith.constant 0 : index
    %3 = vector.load %arg2[%c0_4, %c0_5, %c0_6] : memref<3x128x128xf32, #tpu.memory_space<vmem>>, vector<1x128x128xf32>
    %4 = vector.shape_cast %3 : vector<1x128x128xf32> to vector<128x128xf32>
    %c0_7 = arith.constant 0 : index
    %c0_8 = arith.constant 0 : index
    %c0_9 = arith.constant 0 : index
    %5 = vector.load %arg3[%c0_7, %c0_8, %c0_9] : memref<3x128x128xf32, #tpu.memory_space<vmem>>, vector<1x128x128xf32>
    %6 = vector.shape_cast %5 : vector<1x128x128xf32> to vector<128x128xf32>
    %7 = math.tanh %2 : vector<128x128xf32>
    %8 = arith.negf %4 : vector<128x128xf32>
    %9 = math.exp %8 : vector<128x128xf32>
    %cst = arith.constant 1.000000e+00 : f32
    %10 = vector.broadcast %cst : f32 to vector<128x128xf32>
    %11 = arith.addf %10, %9 : vector<128x128xf32>
    %12 = arith.divf %10, %11 : vector<128x128xf32>
    %13 = arith.mulf %7, %12 : vector<128x128xf32>
    %cst_10 = arith.constant dense<0.000000e+00> : vector<8x128xf32>
    %14 = tpu.matmul %0, %13, %cst_10 {dimension_numbers = #tpu.dot_dimension_numbers<[1], [0], [0], [1], [0, 0, 1, 1], [], []>} : vector<8x128xf32>, vector<128x128xf32>, vector<8x128xf32> -> vector<8x128xf32>
    %cst_11 = arith.constant dense<0.000000e+00> : vector<8x128xf32>
    %15 = tpu.matmul %0, %6, %cst_11 {dimension_numbers = #tpu.dot_dimension_numbers<[1], [0], [0], [1], [0, 0, 1, 1], [], []>} : vector<8x128xf32>, vector<128x128xf32>, vector<8x128xf32> -> vector<8x128xf32>
    %16 = arith.negf %15 : vector<8x128xf32>
    %17 = math.exp %16 : vector<8x128xf32>
    %cst_12 = arith.constant 1.000000e+00 : f32
    %18 = vector.broadcast %cst_12 : f32 to vector<8x128xf32>
    %19 = arith.addf %18, %17 : vector<8x128xf32>
    %20 = arith.divf %18, %19 : vector<8x128xf32>
    %21 = math.absf %0 : vector<8x128xf32>
    %cst_13 = arith.constant 1.000000e-10 : f32
    %22 = vector.broadcast %cst_13 : f32 to vector<8x128xf32>
    %23 = arith.addf %21, %22 : vector<8x128xf32>
    %24 = math.log %23 : vector<8x128xf32>
    %cst_14 = arith.constant dense<0.000000e+00> : vector<8x128xf32>
    %25 = tpu.matmul %24, %13, %cst_14 {dimension_numbers = #tpu.dot_dimension_numbers<[1], [0], [0], [1], [0, 0, 1, 1], [], []>} : vector<8x128xf32>, vector<128x128xf32>, vector<8x128xf32> -> vector<8x128xf32>
    %26 = math.exp %25 : vector<8x128xf32>
    %27 = arith.mulf %20, %14 : vector<8x128xf32>
    %cst_15 = arith.constant 1.000000e+00 : f32
    %28 = vector.broadcast %cst_15 : f32 to vector<8x128xf32>
    %29 = arith.subf %28, %20 : vector<8x128xf32>
    %30 = arith.mulf %29, %26 : vector<8x128xf32>
    %31 = arith.addf %27, %30 : vector<8x128xf32>
    %c1 = arith.constant 1 : index
    %c0_16 = arith.constant 0 : index
    %c0_17 = arith.constant 0 : index
    %32 = vector.load %arg1[%c1, %c0_16, %c0_17] : memref<3x128x128xf32, #tpu.memory_space<vmem>>, vector<1x128x128xf32>
    %33 = vector.shape_cast %32 : vector<1x128x128xf32> to vector<128x128xf32>
    %c1_18 = arith.constant 1 : index
    %c0_19 = arith.constant 0 : index
    %c0_20 = arith.constant 0 : index
    %34 = vector.load %arg2[%c1_18, %c0_19, %c0_20] : memref<3x128x128xf32, #tpu.memory_space<vmem>>, vector<1x128x128xf32>
    %35 = vector.shape_cast %34 : vector<1x128x128xf32> to vector<128x128xf32>
    %c1_21 = arith.constant 1 : index
    %c0_22 = arith.constant 0 : index
    %c0_23 = arith.constant 0 : index
    %36 = vector.load %arg3[%c1_21, %c0_22, %c0_23] : memref<3x128x128xf32, #tpu.memory_space<vmem>>, vector<1x128x128xf32>
    %37 = vector.shape_cast %36 : vector<1x128x128xf32> to vector<128x128xf32>
    %38 = math.tanh %33 : vector<128x128xf32>
    %39 = arith.negf %35 : vector<128x128xf32>
    %40 = math.exp %39 : vector<128x128xf32>
    %cst_24 = arith.constant 1.000000e+00 : f32
    %41 = vector.broadcast %cst_24 : f32 to vector<128x128xf32>
    %42 = arith.addf %41, %40 : vector<128x128xf32>
    %43 = arith.divf %41, %42 : vector<128x128xf32>
    %44 = arith.mulf %38, %43 : vector<128x128xf32>
    %cst_25 = arith.constant dense<0.000000e+00> : vector<8x128xf32>
    %45 = tpu.matmul %31, %44, %cst_25 {dimension_numbers = #tpu.dot_dimension_numbers<[1], [0], [0], [1], [0, 0, 1, 1], [], []>} : vector<8x128xf32>, vector<128x128xf32>, vector<8x128xf32> -> vector<8x128xf32>
    %cst_26 = arith.constant dense<0.000000e+00> : vector<8x128xf32>
    %46 = tpu.matmul %31, %37, %cst_26 {dimension_numbers = #tpu.dot_dimension_numbers<[1], [0], [0], [1], [0, 0, 1, 1], [], []>} : vector<8x128xf32>, vector<128x128xf32>, vector<8x128xf32> -> vector<8x128xf32>
    %47 = arith.negf %46 : vector<8x128xf32>
    %48 = math.exp %47 : vector<8x128xf32>
    %cst_27 = arith.constant 1.000000e+00 : f32
    %49 = vector.broadcast %cst_27 : f32 to vector<8x128xf32>
    %50 = arith.addf %49, %48 : vector<8x128xf32>
    %51 = arith.divf %49, %50 : vector<8x128xf32>
    %52 = math.absf %31 : vector<8x128xf32>
    %cst_28 = arith.constant 1.000000e-10 : f32
    %53 = vector.broadcast %cst_28 : f32 to vector<8x128xf32>
    %54 = arith.addf %52, %53 : vector<8x128xf32>
    %55 = math.log %54 : vector<8x128xf32>
    %cst_29 = arith.constant dense<0.000000e+00> : vector<8x128xf32>
    %56 = tpu.matmul %55, %44, %cst_29 {dimension_numbers = #tpu.dot_dimension_numbers<[1], [0], [0], [1], [0, 0, 1, 1], [], []>} : vector<8x128xf32>, vector<128x128xf32>, vector<8x128xf32> -> vector<8x128xf32>
    %57 = math.exp %56 : vector<8x128xf32>
    %58 = arith.mulf %51, %45 : vector<8x128xf32>
    %cst_30 = arith.constant 1.000000e+00 : f32
    %59 = vector.broadcast %cst_30 : f32 to vector<8x128xf32>
    %60 = arith.subf %59, %51 : vector<8x128xf32>
    %61 = arith.mulf %60, %57 : vector<8x128xf32>
    %62 = arith.addf %58, %61 : vector<8x128xf32>
    %c2 = arith.constant 2 : index
    %c0_31 = arith.constant 0 : index
    %c0_32 = arith.constant 0 : index
    %63 = vector.load %arg1[%c2, %c0_31, %c0_32] : memref<3x128x128xf32, #tpu.memory_space<vmem>>, vector<1x128x128xf32>
    %64 = vector.shape_cast %63 : vector<1x128x128xf32> to vector<128x128xf32>
    %c2_33 = arith.constant 2 : index
    %c0_34 = arith.constant 0 : index
    %c0_35 = arith.constant 0 : index
    %65 = vector.load %arg2[%c2_33, %c0_34, %c0_35] : memref<3x128x128xf32, #tpu.memory_space<vmem>>, vector<1x128x128xf32>
    %66 = vector.shape_cast %65 : vector<1x128x128xf32> to vector<128x128xf32>
    %c2_36 = arith.constant 2 : index
    %c0_37 = arith.constant 0 : index
    %c0_38 = arith.constant 0 : index
    %67 = vector.load %arg3[%c2_36, %c0_37, %c0_38] : memref<3x128x128xf32, #tpu.memory_space<vmem>>, vector<1x128x128xf32>
    %68 = vector.shape_cast %67 : vector<1x128x128xf32> to vector<128x128xf32>
    %69 = math.tanh %64 : vector<128x128xf32>
    %70 = arith.negf %66 : vector<128x128xf32>
    %71 = math.exp %70 : vector<128x128xf32>
    %cst_39 = arith.constant 1.000000e+00 : f32
    %72 = vector.broadcast %cst_39 : f32 to vector<128x128xf32>
    %73 = arith.addf %72, %71 : vector<128x128xf32>
    %74 = arith.divf %72, %73 : vector<128x128xf32>
    %75 = arith.mulf %69, %74 : vector<128x128xf32>
    %cst_40 = arith.constant dense<0.000000e+00> : vector<8x128xf32>
    %76 = tpu.matmul %62, %75, %cst_40 {dimension_numbers = #tpu.dot_dimension_numbers<[1], [0], [0], [1], [0, 0, 1, 1], [], []>} : vector<8x128xf32>, vector<128x128xf32>, vector<8x128xf32> -> vector<8x128xf32>
    %cst_41 = arith.constant dense<0.000000e+00> : vector<8x128xf32>
    %77 = tpu.matmul %62, %68, %cst_41 {dimension_numbers = #tpu.dot_dimension_numbers<[1], [0], [0], [1], [0, 0, 1, 1], [], []>} : vector<8x128xf32>, vector<128x128xf32>, vector<8x128xf32> -> vector<8x128xf32>
    %78 = arith.negf %77 : vector<8x128xf32>
    %79 = math.exp %78 : vector<8x128xf32>
    %cst_42 = arith.constant 1.000000e+00 : f32
    %80 = vector.broadcast %cst_42 : f32 to vector<8x128xf32>
    %81 = arith.addf %80, %79 : vector<8x128xf32>
    %82 = arith.divf %80, %81 : vector<8x128xf32>
    %83 = math.absf %62 : vector<8x128xf32>
    %cst_43 = arith.constant 1.000000e-10 : f32
    %84 = vector.broadcast %cst_43 : f32 to vector<8x128xf32>
    %85 = arith.addf %83, %84 : vector<8x128xf32>
    %86 = math.log %85 : vector<8x128xf32>
    %cst_44 = arith.constant dense<0.000000e+00> : vector<8x128xf32>
    %87 = tpu.matmul %86, %75, %cst_44 {dimension_numbers = #tpu.dot_dimension_numbers<[1], [0], [0], [1], [0, 0, 1, 1], [], []>} : vector<8x128xf32>, vector<128x128xf32>, vector<8x128xf32> -> vector<8x128xf32>
    %88 = math.exp %87 : vector<8x128xf32>
    %89 = arith.mulf %82, %76 : vector<8x128xf32>
    %cst_45 = arith.constant 1.000000e+00 : f32
    %90 = vector.broadcast %cst_45 : f32 to vector<8x128xf32>
    %91 = arith.subf %90, %82 : vector<8x128xf32>
    %92 = arith.mulf %91, %88 : vector<8x128xf32>
    %93 = arith.addf %89, %92 : vector<8x128xf32>
    %c0_46 = arith.constant 0 : index
    %c0_47 = arith.constant 0 : index
    %94 = vector.load %arg4[%c0_46, %c0_47] : memref<8x128xf32, #tpu.memory_space<vmem>>, vector<8x128xf32>
    tpu.vector_store %arg4[%c0_46, %c0_47], %93 {strides = array<i32>} : memref<8x128xf32, #tpu.memory_space<vmem>>, vector<8x128xf32>,
    return
  }
}

</mosaic_0001>

<bundles_post_ra>
// kernel: nalu_forward.1
= control target key start
LH: loop header
LB: loop body
LE: loop exit
PB: predicated region body
PF: predicated region fallthrough
CT: control target
= control target key end

     0   :  { %9 = vsyncpa [#allocation3], 0  ;;  %s2687_s0 = inlined_call_operand.vmem [shape: f32[8,128], index: 0, kind: input, shape index: {}]   ;;  %s2688_s1 = inlined_call_operand.hbm [shape: f32[3,128,128], index: 1, kind: input, shape index: {}]   ;;  %s2689_s2 = inlined_call_operand.hbm [shape: f32[3,128,128], index: 2, kind: input, shape index: {}]   ;;  %s2690_s3 = inlined_call_operand.hbm [shape: f32[3,128,128], index: 3, kind: input, shape index: {}]   ;;  %s2691_s4 = inlined_call_operand.hbm [shape: f32[8,128], index: 4, kind: output, shape index: {}]  }
   0x1   :  { %10 = vsyncpa [#allocation6], 0 }
   0x2   :  { %11 = vsyncpa [#allocation4], 0  ;;  %s2439_s15 = smov [#allocation5]   ;;  %s2440_s17 = smov [#allocation2]  }
   0x3   :  { %s31_s16 = sshll.u32 %s2439_s15, 4  ;;  %s19_s18 = sshll.u32 %s2440_s17, 4  ;;  %s32_s16 = int_to_ptr.vmem [resolvable:$true] %s31_s16  ;;  %s2473_s18 = int_to_ptr.vmem [resolvable:$true] %s19_s18 }
   0x4   :  { %s2345_s21 = scalar_lea.hbm %s2689_s2, 6144 }
   0x5   :  { %p2346_p0 = scmp.ne.s32.totalorder %s2689_s2, %s2345_s21  ;;  %p2349_p1 = scmp.lt.u32.totalorder %s2345_s21, %s2689_s2 }
   0x7   :  { %p2351_p2 = pnand %p2349_p1, %p2346_p0 }
   0x9   :  { %2354 = shalt.err (!%p2351_p2)
}
   0xa   :  { %s2355_s26 = scalar_lea.vmem %s32_s16, 6144  ;;  %p2360_p4 = scmp.lt.s32.totalorder %s32_s16, %s32_s16 }
   0xb   :  { %p2356_p3 = scmp.ne.s32.totalorder %s32_s16, %s2355_s26  ;;  %p2361_p5 = scmp.lt.s32.totalorder %s2355_s26, %s2355_s26 }
   0xd   :  { %p2362_p6 = por %p2361_p5, %p2360_p4 }
   0xf   :  { %p2363_p7 = pnand %p2362_p6, %p2356_p3 }
  0x11   :  { %2366 = shalt.err (!%p2363_p7)
}
  0x12   :  { %s2441_s27 = smov 128   ;;  %s2442_s28 = smov 8  }
  0x13   :  { %37 = dma.hbm_to_vmem [thread:$0]  %s2689_s2, 6144, %s32_s16, [#allocation6], %s2441_s27, %s2441_s27, %s2442_s28  }
  0x14   :  { %s2367_s7 = scalar_lea.hbm %s2688_s1, 6144 }
  0x15   :  { %p2368_p8 = scmp.ne.s32.totalorder %s2688_s1, %s2367_s7  ;;  %p2371_p9 = scmp.lt.u32.totalorder %s2367_s7, %s2688_s1 }
  0x17   :  { %p2373_p10 = pnand %p2371_p9, %p2368_p8 }
  0x19   :  { %2376 = shalt.err (!%p2373_p10)
}
  0x1a   :  { %s2377_s12 = scalar_lea.vmem %s2473_s18, 6144  ;;  %p2382_p12 = scmp.lt.s32.totalorder %s2473_s18, %s2473_s18 }
  0x1b   :  { %p2378_p11 = scmp.ne.s32.totalorder %s2473_s18, %s2377_s12  ;;  %p2383_p13 = scmp.lt.s32.totalorder %s2377_s12, %s2377_s12 }
  0x1d   :  { %p2384_p0 = por %p2383_p13, %p2382_p12 }
  0x1f   :  { %p2385_p1 = pnand %p2384_p0, %p2378_p11 }
  0x21   :  { %2388 = shalt.err (!%p2385_p1)
}
  0x22   :  { %25 = dma.hbm_to_vmem [thread:$0]  %s2688_s1, 6144, %s2473_s18, [#allocation3], %s2441_s27, %s2441_s27, %s2442_s28  }
  0x23   :  { %s2443_s14 = smov [#allocation7]   ;;  %s2389_s19 = scalar_lea.hbm %s2690_s3, 6144 }
  0x24   :  { %s43_s15 = sshll.u32 %s2443_s14, 4  ;;  %p2390_p2 = scmp.ne.s32.totalorder %s2690_s3, %s2389_s19  ;;  %s44_s15 = int_to_ptr.vmem [resolvable:$true] %s43_s15 }
  0x25   :  { %p2393_p3 = scmp.lt.u32.totalorder %s2389_s19, %s2690_s3 }
  0x27   :  { %p2395_p4 = pnand %p2393_p3, %p2390_p2 }
  0x29   :  { %2398 = shalt.err (!%p2395_p4)
}
  0x2a   :  { %s2399_s24 = scalar_lea.vmem %s44_s15, 6144  ;;  %p2404_p6 = scmp.lt.s32.totalorder %s44_s15, %s44_s15 }
  0x2b   :  { %p2400_p5 = scmp.ne.s32.totalorder %s44_s15, %s2399_s24  ;;  %p2405_p7 = scmp.lt.s32.totalorder %s2399_s24, %s2399_s24 }
  0x2d   :  { %p2406_p8 = por %p2405_p7, %p2404_p6 }
  0x2f   :  { %p2407_p9 = pnand %p2406_p8, %p2400_p5 }
  0x31   :  { %2410 = shalt.err (!%p2407_p9)
}
  0x32   :  { %49 = dma.hbm_to_vmem [thread:$0]  %s2690_s3, 6144, %s44_s15, [#allocation6], %s2441_s27, %s2441_s27, %s2442_s28  }
  0x33   :  { %2433 = dma.done.wait [#allocation3], 6144  }
  0x34   :  { %2434 = vsyncadd [#allocation3], 4294961152 }
  0x35   :  { %2435 = dma.done.wait [#allocation6], 12288  }
  0x36   :  { %2436 = vsyncadd [#allocation6], 4294955008  ;;  %v2444_v0 = vmov 0.0|0.0   ;;  %vm2445_vm0 = vmmov 0   ;;  %v2446_v1 = vmov 0.0   ;;  %v92_v2 = vld [vmem:[#allocation7] sm:$0xff] }
  0x37   :  { %1832 = vmatprep.subr.bf16.mxu1 %v2444_v0  ;;  %1808 = vmatprep.subr.bf16.mxu0 %v2444_v0  ;;  %v93_v3 = vld [vmem:[#allocation7 + $0x8] sm:$0xff]  ;;  %v94_v4 = vld [vmem:[#allocation7 + $0x10] sm:$0xff]  ;;  %v95_v6 = vld [vmem:[#allocation7 + $0x18] sm:$0xff] }
  0x38   :  { %1560 = vmatprep.mubr.msk.f32.mxu1 %vm2445_vm0, %v2446_v1  ;;  %1525 = vmatprep.mubr.msk.f32.mxu0 %vm2445_vm0, %v2446_v1  ;;  %v1833_v5 = vpack.c.bf16 %v93_v3, %v92_v2  ;;  %v1836_v7 = vpack.c.bf16 %v95_v6, %v94_v4  ;;  %v96_v8 = vld [vmem:[#allocation7 + $0x20] sm:$0xff]  ;;  %v97_v9 = vld [vmem:[#allocation7 + $0x28] sm:$0xff]  ;;  %v78_v15 = vld [vmem:[#allocation5 + $0x10] sm:$0xff] }
  0x39   :  { %v76_v10 = vld [vmem:[#allocation5] sm:$0xff]  ;;  %v77_v11 = vld [vmem:[#allocation5 + $0x8] sm:$0xff]  ;;  %v1839_v14 = vpack.c.bf16 %v97_v9, %v96_v8  ;;  %v98_v16 = vld [vmem:[#allocation7 + $0x30] sm:$0xff]  ;;  %v1291_v19 = vmul.f32 -1.442695, %v78_v15 }
  0x3a   :  { %1834 = vmatpush3.bf16.msra.mxu1 %v1833_v5  ;;  %v1289_v12 = vmul.f32 -1.442695, %v76_v10  ;;  %v1290_v13 = vmul.f32 -1.442695, %v77_v11  ;;  %v99_v17 = vld [vmem:[#allocation7 + $0x38] sm:$0xff]  ;;  %v80_v21 = vld [vmem:[#allocation5 + $0x20] sm:$0xff] }
  0x3b   :  { %1835 = vmatprep.subr.bf16.mxu1 %v2444_v0  ;;  %v79_v18 = vld [vmem:[#allocation5 + $0x18] sm:$0xff]  ;;  %v1842_v22 = vpack.c.bf16 %v99_v17, %v98_v16  ;;  %v81_v23 = vld [vmem:[#allocation5 + $0x28] sm:$0xff]  ;;  %v100_v24 = vld [vmem:[#allocation7 + $0x40] sm:$0xff]  ;;  %v1293_v28 = vmul.f32 -1.442695, %v80_v21 }
  0x3c   :  { %2033 = vpow2.f32 %v1289_v12  ;;  %v1292_v20 = vmul.f32 -1.442695, %v79_v18  ;;  %v101_v25 = vld [vmem:[#allocation7 + $0x48] sm:$0xff]  ;;  %v60_v26 = vld [vmem:[#allocation2] sm:$0xff]  ;;  %v1294_v29 = vmul.f32 -1.442695, %v81_v23 }
  0x3d   :  { %2035 = vpow2.f32 %v1290_v13  ;;  %v61_v27 = vld [vmem:[#allocation2 + $0x8] sm:$0xff]  ;;  %v1845_v30 = vpack.c.bf16 %v101_v25, %v100_v24  ;;  %v102_v31 = vld [vmem:[#allocation7 + $0x50] sm:$0xff]  ;;  %v103_v32 = vld [vmem:[#allocation7 + $0x58] sm:$0xff] }
  0x3e   :  { %1837 = vmatpush3.bf16.msra.mxu1 %v1836_v7  ;;  %2037 = vpow2.f32 %v1291_v19  ;;  %v62_v33 = vld [vmem:[#allocation2 + $0x10] sm:$0xff]  ;;  %v63_v35 = vld [vmem:[#allocation2 + $0x18] sm:$0xff]  ;;  %v1848_v39 = vpack.c.bf16 %v103_v32, %v102_v31  ;;  %v104_v42 = vld [vmem:[#allocation7 + $0x60] sm:$0xff] }
  0x3f   :  { %1838 = vmatprep.subr.bf16.mxu1 %v2444_v0  ;;  %2039 = vpow2.f32 %v1292_v20  ;;  %v82_v34 = vld [vmem:[#allocation5 + $0x30] sm:$0xff]  ;;  %v83_v36 = vld [vmem:[#allocation5 + $0x38] sm:$0xff]  ;;  %v105_v43 = vld [vmem:[#allocation7 + $0x68] sm:$0xff] }
  0x40   :  { %2041 = vtanh.f32 %v60_v26  ;;  %v1295_v41 = vmul.f32 -1.442695, %v82_v34  ;;  %v1296_v45 = vmul.f32 -1.442695, %v83_v36  ;;  %v84_v47 = vld [vmem:[#allocation5 + $0x40] sm:$0xff]  ;;  %v1851_v49 = vpack.c.bf16 %v105_v43, %v104_v42  ;;  %v106_v51 = vld [vmem:[#allocation7 + $0x70] sm:$0xff] }
  0x41   :  { %2043 = vtanh.f32 %v61_v27  ;;  %v107_v52 = vld [vmem:[#allocation7 + $0x78] sm:$0xff]  ;;  %v64_v54 = vld [vmem:[#allocation2 + $0x20] sm:$0xff]  ;;  %v65_v56 = vld [vmem:[#allocation2 + $0x28] sm:$0xff]  ;;  %v1297_v58 = vmul.f32 -1.442695, %v84_v47 }
  0x42   :  { %1840 = vmatpush3.bf16.msra.mxu1 %v1839_v14  ;;  %2045 = vpow2.f32 %v1293_v28  ;;  %v85_v57 = vld [vmem:[#allocation5 + $0x48] sm:$0xff]  ;;  %v1854_v61 = vpack.c.bf16 %v107_v52, %v106_v51  ;;  %v86_v3 = vld [vmem:[#allocation5 + $0x50] sm:$0xff]  ;;  %v2541_v9 = vld [vmem:[%s2687_s0] sm:$0xff]  ;;  %s2447_s0 = smov [#allocation8]  }
  0x43   :  { %1841 = vmatprep.subr.bf16.mxu1 %v2444_v0  ;;  %2047 = vpow2.f32 %v1294_v29  ;;  %v1298_v2 = vmul.f32 -1.442695, %v85_v57  ;;  %v66_v7 = vld [vmem:[#allocation2 + $0x30] sm:$0xff]  ;;  %v67_v10 = vld [vmem:[#allocation2 + $0x38] sm:$0xff]  ;;  %v1299_v12 = vmul.f32 -1.442695, %v86_v3 }
  0x44   :  { %2049 = vtanh.f32 %v62_v33  ;;  %v87_v11 = vld [vmem:[#allocation5 + $0x58] sm:$0xff]  ;;  %v88_v20 = vld [vmem:[#allocation5 + $0x60] sm:$0xff]  ;;  %v89_v27 = vld [vmem:[#allocation5 + $0x68] sm:$0xff]  ;;  %s1279_s26 = sshll.u32 %s2447_s0, 4  ;;  %s1280_s26 = int_to_ptr.vmem [resolvable:$true] %s1279_s26 }
  0x45   :  { %2051 = vtanh.f32 %v63_v35  ;;  %v1300_v19 = vmul.f32 -1.442695, %v87_v11  ;;  %v68_v26 = vld [vmem:[#allocation2 + $0x40] sm:$0xff]  ;;  %v1301_v31 = vmul.f32 -1.442695, %v88_v20  ;;  %v71_v47 = vld [vmem:[#allocation2 + $0x58] sm:$0xff]  ;;  %p2416_p11 = scmp.lt.s32.totalorder %s1280_s26, %s1280_s26 }
  0x46   :  { %1843 = vmatpush3.bf16.msra.mxu1 %v1842_v22  ;;  %v2034_v37 = vpop.eup %2033  ;;  %v1302_v35 = vmul.f32 -1.442695, %v89_v27  ;;  %s2411_s27 = scalar_lea.vmem %s1280_s26, 128 }
  0x47   :  { %1844 = vmatprep.subr.bf16.mxu1 %v2444_v0  ;;  %v2036_v38 = vpop.eup %2035  ;;  %v172_v40 = vadd.f32 1.0, %v2034_v37  ;;  %p2412_p10 = scmp.ne.s32.totalorder %s1280_s26, %s2411_s27  ;;  %p2417_p12 = scmp.lt.s32.totalorder %s2411_s27, %s2411_s27 }
  0x48   :  { %v173_v44 = vadd.f32 1.0, %v2036_v38  ;;  %v2038_v46 = vpop.eup %2037  ;;  %v90_v38 = vld [vmem:[#allocation5 + $0x70] sm:$0xff] }
  0x49   :  { %2053 = vrcp.f32 %v172_v40  ;;  %v2040_v48 = vpop.eup %2039  ;;  %v174_v50 = vadd.f32 1.0, %v2038_v46  ;;  %p2418_p13 = por %p2417_p12, %p2416_p11 }
  0x4a   :  { %1846 = vmatpush3.bf16.msra.mxu1 %v1845_v30  ;;  %2055 = vrcp.f32 %v173_v44  ;;  %v175_v53 = vadd.f32 1.0, %v2040_v48  ;;  %v2042_v55 = vpop.eup %2041  ;;  %v69_v30 = vld [vmem:[#allocation2 + $0x48] sm:$0xff]  ;;  %v91_v44 = vld [vmem:[#allocation5 + $0x78] sm:$0xff]  ;;  %v1303_v48 = vmul.f32 -1.442695, %v90_v38 }
  0x4b   :  { %1847 = vmatprep.subr.bf16.mxu1 %v2444_v0  ;;  %2057 = vpow2.f32 %v1295_v41  ;;  %v2044_v59 = vpop.eup %2043  ;;  %v70_v41 = vld [vmem:[#allocation2 + $0x50] sm:$0xff]  ;;  %v1304_v52 = vmul.f32 -1.442695, %v91_v44  ;;  %v481_v44 = vld [vmem:[#allocation5 + $0x88] sm:$0xff]  ;;  %p2419_p0 = pnand %p2418_p13, %p2412_p10 }
  0x4c   :  { %2059 = vpow2.f32 %v1296_v45  ;;  %v2046_v60 = vpop.eup %2045 }
  0x4d   :  { %2061 = vrcp.f32 %v174_v50  ;;  %v2048_v62 = vpop.eup %2047  ;;  %v176_v63 = vadd.f32 1.0, %v2046_v60 }
  0x4e   :  { %1849 = vmatpush3.bf16.msra.mxu1 %v1848_v39  ;;  %2063 = vrcp.f32 %v175_v53  ;;  %v2050_v4 = vpop.eup %2049  ;;  %v177_v5 = vadd.f32 1.0, %v2048_v62 }
  0x4f   :  { %1850 = vmatprep.subr.bf16.mxu1 %v2444_v0  ;;  %2065 = vtanh.f32 %v64_v54  ;;  %v2052_v6 = vpop.eup %2051 }
  0x50   :  { %2067 = vtanh.f32 %v65_v56 }
  0x51   :  { %2069 = vpow2.f32 %v1297_v58 }
  0x52   :  { %1852 = vmatpush3.bf16.msra.mxu1 %v1851_v49  ;;  %2071 = vrcp.f32 %v176_v63 }
  0x53   :  { %1853 = vmatprep.subr.bf16.mxu1 %v2444_v0  ;;  %v2054_v8 = vpop.eup %2053  ;;  %2073 = vrcp.f32 %v177_v5 }
  0x54   :  { %v2056_v13 = vpop.eup %2055  ;;  %v220_v14 = vmul.f32 %v2054_v8, %v2042_v55  ;;  %2075 = vpow2.f32 %v1298_v2  ;;  %v73_v2 = vld [vmem:[#allocation2 + $0x68] sm:$0xff] }
  0x55   :  { %v2058_v15 = vpop.eup %2057  ;;  %v221_v16 = vmul.f32 %v2056_v13, %v2044_v59  ;;  %2077 = vtanh.f32 %v66_v7 }
  0x56   :  { %1855 = vmatpush3.bf16.msra.mxu1 %v1854_v61  ;;  %v2060_v17 = vpop.eup %2059  ;;  %2079 = vtanh.f32 %v67_v10  ;;  %v178_v18 = vadd.f32 1.0, %v2058_v15  ;;  %v72_v61 = vld [vmem:[#allocation2 + $0x60] sm:$0xff]  ;;  %v75_v15 = vld [vmem:[#allocation2 + $0x78] sm:$0xff] }
  0x57   :  { %1880 = vmatprep.subr.bf16.mxu1 %v2444_v0  ;;  %v2062_v21 = vpop.eup %2061  ;;  %v2545_v22 = vpack.c.bf16 %v221_v16, %v220_v14  ;;  %v179_v23 = vadd.f32 1.0, %v2060_v17  ;;  %2081 = vpow2.f32 %v1299_v12  ;;  %v74_v12 = vld [vmem:[#allocation2 + $0x70] sm:$0xff] }
  0x58   :  { %v2064_v24 = vpop.eup %2063  ;;  %v222_v25 = vmul.f32 %v2062_v21, %v2050_v4  ;;  %2083 = vrcp.f32 %v178_v18 }
  0x59   :  { %1561 = vmatmul.mubr.f32.vlgmr.msra.gmra.mrb[0].mxu1 %v2541_v9  ;;  %v2066_v28 = vpop.eup %2065  ;;  %1810 = vmatpush3.bf16.msra.mxu0 %v2545_v22  ;;  %v223_v29 = vmul.f32 %v2064_v24, %v2052_v6  ;;  %2085 = vrcp.f32 %v179_v23 }
  0x5a   :  { %1630 = vmatprep.mubr.msk.f32.mxu1 %vm2445_vm0, %v2446_v1  ;;  %v2068_v32 = vpop.eup %2067  ;;  %1811 = vmatprep.subr.bf16.mxu0 %v2444_v0  ;;  %2087 = vpow2.f32 %v1300_v19 }
  0x5b   :  { %v2070_v33 = vpop.eup %2069  ;;  %v2551_v34 = vpack.c.bf16 %v223_v29, %v222_v25  ;;  %2089 = vtanh.f32 %v68_v26 }
  0x5c   :  { %v2072_v36 = vpop.eup %2071  ;;  %2091 = vtanh.f32 %v69_v30  ;;  %v180_v37 = vadd.f32 1.0, %v2070_v33 }
  0x5d   :  { %v2074_v39 = vpop.eup %2073  ;;  %1813 = vmatpush3.bf16.msra.mxu0 %v2551_v34  ;;  %v224_v40 = vmul.f32 %v2072_v36, %v2066_v28  ;;  %2093 = vpow2.f32 %v1301_v31 }
  0x5e   :  { %v2076_v42 = vpop.eup %2075  ;;  %1814 = vmatprep.subr.bf16.mxu0 %v2444_v0  ;;  %v225_v43 = vmul.f32 %v2074_v39, %v2068_v32  ;;  %2095 = vrcp.f32 %v180_v37 }
  0x5f   :  { %v2078_v45 = vpop.eup %2077  ;;  %v181_v46 = vadd.f32 1.0, %v2076_v42  ;;  %2097 = vpow2.f32 %v1302_v35  ;;  %v382_v42 = vand.u32 2147483647, %v2541_v9 }
  0x60   :  { %v2080_v49 = vpop.eup %2079  ;;  %v2555_v50 = vpack.c.bf16 %v225_v43, %v224_v40  ;;  %2099 = vtanh.f32 %v70_v41 }
  0x61   :  { %v2082_v51 = vpop.eup %2081  ;;  %2101 = vrcp.f32 %v181_v46  ;;  %v383_v43 = vadd.f32 1e-10, %v382_v42  ;;  %v1307_v46 = vmul.f32 -1.442695, %v481_v44 }
  0x62   :  { %v2084_v53 = vpop.eup %2083  ;;  %1816 = vmatpush3.bf16.msra.mxu0 %v2555_v50  ;;  %2103 = vtanh.f32 %v71_v47  ;;  %v182_v54 = vadd.f32 1.0, %v2082_v51  ;;  %v482_v47 = vld [vmem:[#allocation5 + $0x90] sm:$0xff]  ;;  %v484_v51 = vld [vmem:[#allocation5 + $0xa0] sm:$0xff] }
  0x63   :  { %v2086_v55 = vpop.eup %2085  ;;  %1817 = vmatprep.subr.bf16.mxu0 %v2444_v0  ;;  %v226_v56 = vmul.f32 %v2084_v53, %v2078_v45  ;;  %2105 = vpow2.f32 %v1303_v48  ;;  %v483_v48 = vld [vmem:[#allocation5 + $0x98] sm:$0xff]  ;;  %v1310_v53 = vmul.f32 -1.442695, %v484_v51 }
  0x64   :  { %v2088_v57 = vpop.eup %2087  ;;  %v227_v58 = vmul.f32 %v2086_v55, %v2080_v49  ;;  %2107 = vrcp.f32 %v182_v54  ;;  %v1308_v49 = vmul.f32 -1.442695, %v482_v47  ;;  %v470_v51 = vld [vmem:[#allocation2 + $0xb8] sm:$0xff] }
  0x65   :  { %v2090_v59 = vpop.eup %2089  ;;  %v183_v60 = vadd.f32 1.0, %v2088_v57  ;;  %2109 = vpow2.f32 %v1304_v52  ;;  %v485_v52 = vld [vmem:[#allocation5 + $0xa8] sm:$0xff]  ;;  %v463_v57 = vld [vmem:[#allocation2 + $0x80] sm:$0xff] }
  0x66   :  { %v2092_v62 = vpop.eup %2091  ;;  %v2559_v63 = vpack.c.bf16 %v227_v58, %v226_v56  ;;  %v1311_v54 = vmul.f32 -1.442695, %v485_v52  ;;  %v464_v58 = vld [vmem:[#allocation2 + $0x88] sm:$0xff] }
  0x67   :  { %v2094_v3 = vpop.eup %2093  ;;  %2111 = vrcp.f32 %v183_v60  ;;  %v497_v60 = vld [vmem:[#allocation7 + $0x80] sm:$0xff] }
  0x68   :  { %v2096_v4 = vpop.eup %2095  ;;  %1819 = vmatpush3.bf16.msra.mxu0 %v2559_v63  ;;  %2113 = vtanh.f32 %v72_v61  ;;  %v184_v5 = vadd.f32 1.0, %v2094_v3  ;;  %v499_v3 = vld [vmem:[#allocation7 + $0x90] sm:$0xff] }
  0x69   :  { %v2098_v6 = vpop.eup %2097  ;;  %1820 = vmatprep.subr.bf16.mxu0 %v2444_v0  ;;  %2115 = vtanh.f32 %v73_v2  ;;  %v228_v8 = vmul.f32 %v2096_v4, %v2090_v59  ;;  %v465_v2 = vld [vmem:[#allocation2 + $0x90] sm:$0xff]  ;;  %v500_v4 = vld [vmem:[#allocation7 + $0x98] sm:$0xff] }
  0x6a   :  { %v2100_v7 = vpop.eup %2099  ;;  %v185_v10 = vadd.f32 1.0, %v2098_v6  ;;  %2117 = vrcp.f32 %v184_v5  ;;  %v466_v6 = vld [vmem:[#allocation2 + $0x98] sm:$0xff] }
  0x6b   :  { %v2102_v11 = vpop.eup %2101 }
  0x6c   :  { %v2104_v13 = vpop.eup %2103  ;;  %v229_v14 = vmul.f32 %v2102_v11, %v2092_v62  ;;  %2119 = vrcp.f32 %v185_v10  ;;  %v498_v62 = vld [vmem:[#allocation7 + $0x88] sm:$0xff]  ;;  %v1908_v10 = vpack.c.bf16 %v500_v4, %v499_v3 }
  0x6d   :  { %v2106_v16 = vpop.eup %2105  ;;  %2121 = vtanh.f32 %v74_v12  ;;  %v501_v12 = vld [vmem:[#allocation7 + $0xa0] sm:$0xff] }
  0x6e   :  { %v2108_v17 = vpop.eup %2107  ;;  %v1821_v18 = vpack.c.bf16 %v229_v14, %v228_v8  ;;  %v186_v19 = vadd.f32 1.0, %v2106_v16  ;;  %2123 = vtanh.f32 %v75_v15  ;;  %v467_v14 = vld [vmem:[#allocation2 + $0xa0] sm:$0xff]  ;;  %v468_v16 = vld [vmem:[#allocation2 + $0xa8] sm:$0xff] }
  0x6f   :  { %v2110_v20 = vpop.eup %2109  ;;  %v230_v21 = vmul.f32 %v2108_v17, %v2100_v7 }
  0x70   :  { %1822 = vmatpush3.bf16.msra.mxu0 %v1821_v18  ;;  %v187_v23 = vadd.f32 1.0, %v2110_v20  ;;  %2125 = vrcp.f32 %v186_v19  ;;  %v486_v20 = vld [vmem:[#allocation5 + $0xb0] sm:$0xff] }
  0x71   :  { %v2112_v24 = vpop.eup %2111  ;;  %1823 = vmatprep.subr.bf16.mxu0 %v2444_v0 }
  0x72   :  { %v2114_v25 = vpop.eup %2113  ;;  %v231_v26 = vmul.f32 %v2112_v24, %v2104_v13  ;;  %2127 = vrcp.f32 %v187_v23  ;;  %v502_v13 = vld [vmem:[#allocation7 + $0xa8] sm:$0xff]  ;;  %v487_v23 = vld [vmem:[#allocation5 + $0xb8] sm:$0xff]  ;;  %v503_v24 = vld [vmem:[#allocation7 + $0xb0] sm:$0xff] }
  0x73   :  { %v2116_v27 = vpop.eup %2115  ;;  %2129 = vlog2.f32 %v383_v43  ;;  %v1911_v19 = vpack.c.bf16 %v502_v13, %v501_v12 }
  0x74   :  { %v2118_v28 = vpop.eup %2117  ;;  %v1824_v29 = vpack.c.bf16 %v231_v26, %v230_v21  ;;  %v488_v26 = vld [vmem:[#allocation5 + $0xc0] sm:$0xff] }
  0x75   :  { %v232_v30 = vmul.f32 %v2118_v28, %v2114_v25  ;;  %v504_v25 = vld [vmem:[#allocation7 + $0xb8] sm:$0xff]  ;;  %v1312_v28 = vmul.f32 -1.442695, %v486_v20 }
  0x76   :  { %v2120_v31 = vpop.eup %2119  ;;  %1825 = vmatpush3.bf16.msra.mxu0 %v1824_v29  ;;  %v495_v20 = vld [vmem:[#allocation5 + $0xf8] sm:$0xff] }
  0x77   :  { %1826 = vmatprep.subr.bf16.mxu0 %v2444_v0  ;;  %v233_v32 = vmul.f32 %v2120_v31, %v2116_v27  ;;  %v2122_v33 = vpop.eup %2121  ;;  %v1914_v31 = vpack.c.bf16 %v504_v25, %v503_v24  ;;  %v507_v25 = vld [vmem:[#allocation7 + $0xd0] sm:$0xff] }
  0x78   :  { %v2124_v35 = vpop.eup %2123 }
  0x79   :  { %v1827_v36 = vpack.c.bf16 %v233_v32, %v232_v30  ;;  %v1313_v30 = vmul.f32 -1.442695, %v487_v23 }
  0x7a   :  { %v2126_v37 = vpop.eup %2125 }
  0x7b   :  { %1828 = vmatpush3.bf16.msra.mxu0 %v1827_v36  ;;  %v234_v38 = vmul.f32 %v2126_v37, %v2122_v33  ;;  %v489_v33 = vld [vmem:[#allocation5 + $0xc8] sm:$0xff] }
  0x7c   :  { %v2128_v39 = vpop.eup %2127  ;;  %1829 = vmatprep.subr.bf16.mxu0 %v2444_v0  ;;  %v1315_v42 = vmul.f32 -1.442695, %v489_v33  ;;  %v1321_v33 = vmul.f32 -1.442695, %v495_v20 }
  0x7d   :  { %v235_v40 = vmul.f32 %v2128_v39, %v2124_v35  ;;  %v1314_v35 = vmul.f32 -1.442695, %v488_v26  ;;  %v508_v26 = vld [vmem:[#allocation7 + $0xd8] sm:$0xff] }
  0x7f   :  { %v1830_v41 = vpack.c.bf16 %v235_v40, %v234_v38  ;;  %v490_v38 = vld [vmem:[#allocation5 + $0xd0] sm:$0xff] }
  0x81   :  { %1831 = vmatpush3.bf16.msra.mxu0 %v1830_v41 }
  0x82   :  { %1856 = vmatprep.subr.bf16.mxu0 %v2444_v0 }
  0x84   :  { %1526 = vmatmul.mubr.f32.vlgmr.msra.gmra.mrb[0].mxu0 %v2541_v9 }
  0x85   :  { %1858 = vmatpush3.bf16.msra.mxu0 %v2545_v22  ;;  %1595 = vmatprep.mubr.msk.f32.mxu0 %vm2445_vm0, %v2446_v1  ;;  %v2130_v22 = vpop.eup %2129 }
  0x86   :  { %1859 = vmatprep.subr.bf16.mxu0 %v2444_v0  ;;  %v385_v9 = vmul.f32 0.6931472, %v2130_v22 }
  0x89   :  { %1861 = vmatpush3.bf16.msra.mxu0 %v2551_v34  ;;  %v480_v34 = vld [vmem:[#allocation5 + $0x80] sm:$0xff] }
  0x8a   :  { %1862 = vmatprep.subr.bf16.mxu0 %v2444_v0  ;;  %v1306_v45 = vmul.f32 -1.442695, %v480_v34  ;;  %v1316_v34 = vmul.f32 -1.442695, %v490_v38 }
  0x8c   :  { %2131 = vpow2.f32 %v1306_v45 }
  0x8d   :  { %1864 = vmatpush3.bf16.msra.mxu0 %v2555_v50  ;;  %2133 = vpow2.f32 %v1307_v46  ;;  %v1309_v50 = vmul.f32 -1.442695, %v483_v48  ;;  %v492_v46 = vld [vmem:[#allocation5 + $0xe0] sm:$0xff] }
  0x8e   :  { %1865 = vmatprep.subr.bf16.mxu0 %v2444_v0  ;;  %2135 = vpow2.f32 %v1308_v49  ;;  %v469_v49 = vld [vmem:[#allocation2 + $0xb0] sm:$0xff] }
  0x8f   :  { %2137 = vpow2.f32 %v1309_v50 }
  0x90   :  { %2139 = vpow2.f32 %v1310_v53 }
  0x91   :  { %1867 = vmatpush3.bf16.msra.mxu0 %v2559_v63  ;;  %2141 = vpow2.f32 %v1311_v54  ;;  %v1905_v63 = vpack.c.bf16 %v498_v62, %v497_v60  ;;  %v472_v60 = vld [vmem:[#allocation2 + $0xc8] sm:$0xff] }
  0x92   :  { %1868 = vmatprep.subr.bf16.mxu0 %v2444_v0  ;;  %2143 = vtanh.f32 %v463_v57 }
  0x93   :  { %2145 = vtanh.f32 %v464_v58 }
  0x95   :  { %1870 = vmatpush3.bf16.msra.mxu0 %v1821_v18 }
  0x96   :  { %1871 = vmatprep.subr.bf16.mxu0 %v2444_v0  ;;  %v2132_v55 = vpop.eup %2131 }
  0x97   :  { %v2134_v56 = vpop.eup %2133  ;;  %v577_v59 = vadd.f32 1.0, %v2132_v55  ;;  %v1318_v55 = vmul.f32 -1.442695, %v492_v46 }
  0x98   :  { %v578_v61 = vadd.f32 1.0, %v2134_v56  ;;  %v2136_v5 = vpop.eup %2135 }
  0x99   :  { %1873 = vmatpush3.bf16.msra.mxu0 %v1824_v29  ;;  %2147 = vrcp.f32 %v577_v59  ;;  %v2138_v7 = vpop.eup %2137  ;;  %v579_v8 = vadd.f32 1.0, %v2136_v5  ;;  %v471_v59 = vld [vmem:[#allocation2 + $0xc0] sm:$0xff] }
  0x9a   :  { %1874 = vmatprep.subr.bf16.mxu0 %v2444_v0  ;;  %2149 = vrcp.f32 %v578_v61  ;;  %v580_v11 = vadd.f32 1.0, %v2138_v7  ;;  %v2140_v15 = vpop.eup %2139  ;;  %v493_v61 = vld [vmem:[#allocation5 + $0xe8] sm:$0xff] }
  0x9b   :  { %2151 = vtanh.f32 %v465_v2  ;;  %v2142_v17 = vpop.eup %2141  ;;  %v581_v18 = vadd.f32 1.0, %v2140_v15  ;;  %v506_v15 = vld [vmem:[#allocation7 + $0xc8] sm:$0xff] }
  0x9c   :  { %2153 = vtanh.f32 %v466_v6  ;;  %v582_v21 = vadd.f32 1.0, %v2142_v17  ;;  %v2144_v27 = vpop.eup %2143  ;;  %v1319_v6 = vmul.f32 -1.442695, %v493_v61  ;;  %v478_v61 = vld [vmem:[#allocation2 + $0xf8] sm:$0xff] }
  0x9d   :  { %1876 = vmatpush3.bf16.msra.mxu0 %v1827_v36  ;;  %2155 = vrcp.f32 %v579_v8  ;;  %v2146_v29 = vpop.eup %2145  ;;  %v473_v8 = vld [vmem:[#allocation2 + $0xd0] sm:$0xff] }
  0x9e   :  { %1877 = vmatprep.subr.bf16.mxu0 %v2444_v0  ;;  %2157 = vrcp.f32 %v580_v11 }
  0x9f   :  { %2159 = vtanh.f32 %v467_v14  ;;  %v505_v14 = vld [vmem:[#allocation7 + $0xc0] sm:$0xff] }
  0xa0   :  { %2161 = vtanh.f32 %v468_v16  ;;  %v1917_v17 = vpack.c.bf16 %v506_v15, %v505_v14 }
  0xa1   :  { %1879 = vmatpush3.bf16.msra.mxu0 %v1830_v41  ;;  %2163 = vrcp.f32 %v581_v18  ;;  %v474_v18 = vld [vmem:[#allocation2 + $0xd8] sm:$0xff] }
  0xa2   :  { %1904 = vmatprep.subr.bf16.mxu0 %v2444_v0  ;;  %2165 = vrcp.f32 %v582_v21 }
  0xa3   :  { %v2148_v32 = vpop.eup %2147  ;;  %2167 = vpow2.f32 %v1312_v28 }
  0xa4   :  { %1596 = vmatmul.mubr.f32.vlgmr.msra.gmra.mrb[2].mxu0 %v385_v9  ;;  %v2150_v36 = vpop.eup %2149  ;;  %v625_v37 = vmul.f32 %v2148_v32, %v2144_v27  ;;  %2169 = vpow2.f32 %v1313_v30  ;;  %v491_v9 = vld [vmem:[#allocation5 + $0xd8] sm:$0xff]  ;;  %v475_v30 = vld [vmem:[#allocation2 + $0xe0] sm:$0xff]  ;;  %v510_v32 = vld [vmem:[#allocation7 + $0xe8] sm:$0xff] }
  0xa5   :  { %1665 = vmatprep.mubr.msk.f32.mxu0 %vm2445_vm0, %v2446_v1  ;;  %1906 = vmatpush3.bf16.msra.mxu0 %v1905_v63  ;;  %v2152_v39 = vpop.eup %2151  ;;  %v626_v40 = vmul.f32 %v2150_v36, %v2146_v29  ;;  %2171 = vpow2.f32 %v1314_v35  ;;  %v1317_v52 = vmul.f32 -1.442695, %v491_v9  ;;  %v1920_v29 = vpack.c.bf16 %v508_v26, %v507_v25  ;;  %v512_v9 = vld [vmem:[#allocation7 + $0xf8] sm:$0xff] }
  0xa6   :  { %1907 = vmatprep.subr.bf16.mxu0 %v2444_v0  ;;  %v2154_v41 = vpop.eup %2153  ;;  %2173 = vpow2.f32 %v1315_v42 }
  0xa7   :  { %v2156_v43 = vpop.eup %2155  ;;  %v2588_v22 = vpack.c.bf16 %v626_v40, %v625_v37  ;;  %2175 = vpow2.f32 %v1316_v34 }
  0xa8   :  { %v2158_v44 = vpop.eup %2157  ;;  %v627_v45 = vmul.f32 %v2156_v43, %v2152_v39  ;;  %2177 = vtanh.f32 %v469_v49  ;;  %v476_v39 = vld [vmem:[#allocation2 + $0xe8] sm:$0xff]  ;;  %v511_v43 = vld [vmem:[#allocation7 + $0xf0] sm:$0xff] }
  0xa9   :  { %1909 = vmatpush3.bf16.msra.mxu0 %v1908_v10  ;;  %v2160_v47 = vpop.eup %2159  ;;  %1882 = vmatpush3.bf16.msra.mxu1 %v2588_v22  ;;  %v628_v48 = vmul.f32 %v2158_v44, %v2154_v41  ;;  %2179 = vtanh.f32 %v470_v51  ;;  %v494_v10 = vld [vmem:[#allocation5 + $0xf0] sm:$0xff] }
  0xaa   :  { %1910 = vmatprep.subr.bf16.mxu0 %v2444_v0  ;;  %v2162_v50 = vpop.eup %2161  ;;  %1883 = vmatprep.subr.bf16.mxu1 %v2444_v0  ;;  %2181 = vpow2.f32 %v1317_v52  ;;  %v1320_v21 = vmul.f32 -1.442695, %v494_v10 }
  0xab   :  { %v2164_v53 = vpop.eup %2163  ;;  %v2593_v54 = vpack.c.bf16 %v628_v48, %v627_v45  ;;  %2183 = vpow2.f32 %v1318_v55 }
  0xac   :  { %v2166_v56 = vpop.eup %2165  ;;  %v629_v57 = vmul.f32 %v2164_v53, %v2160_v47  ;;  %2185 = vtanh.f32 %v471_v59 }
  0xad   :  { %1912 = vmatpush3.bf16.msra.mxu0 %v1911_v19  ;;  %1885 = vmatpush3.bf16.msra.mxu1 %v2593_v54  ;;  %v630_v58 = vmul.f32 %v2166_v56, %v2162_v50  ;;  %v2168_v62 = vpop.eup %2167  ;;  %2187 = vtanh.f32 %v472_v60  ;;  %v1926_v50 = vpack.c.bf16 %v512_v9, %v511_v43  ;;  %v477_v56 = vld [vmem:[#allocation2 + $0xf0] sm:$0xff] }
  0xae   :  { %1913 = vmatprep.subr.bf16.mxu0 %v2444_v0  ;;  %1886 = vmatprep.subr.bf16.mxu1 %v2444_v0  ;;  %v2170_v2 = vpop.eup %2169  ;;  %v583_v3 = vadd.f32 1.0, %v2168_v62  ;;  %v887_v9 = vld [vmem:[#allocation5 + $0x110] sm:$0xff] }
  0xaf   :  { %v2597_v63 = vpack.c.bf16 %v630_v58, %v629_v57  ;;  %v2172_v4 = vpop.eup %2171  ;;  %v584_v5 = vadd.f32 1.0, %v2170_v2 }
  0xb0   :  { %2189 = vrcp.f32 %v583_v3  ;;  %v585_v7 = vadd.f32 1.0, %v2172_v4  ;;  %v2174_v11 = vpop.eup %2173 }
  0xb1   :  { %1915 = vmatpush3.bf16.msra.mxu0 %v1914_v31  ;;  %1888 = vmatpush3.bf16.msra.mxu1 %v2597_v63  ;;  %2191 = vrcp.f32 %v584_v5  ;;  %v2176_v12 = vpop.eup %2175  ;;  %v586_v13 = vadd.f32 1.0, %v2174_v11  ;;  %v509_v31 = vld [vmem:[#allocation7 + $0xe0] sm:$0xff] }
  0xb2   :  { %1916 = vmatprep.subr.bf16.mxu0 %v2444_v0  ;;  %1889 = vmatprep.subr.bf16.mxu1 %v2444_v0  ;;  %2193 = vrcp.f32 %v585_v7  ;;  %v2178_v16 = vpop.eup %2177  ;;  %v587_v19 = vadd.f32 1.0, %v2176_v12  ;;  %v1923_v40 = vpack.c.bf16 %v510_v32, %v509_v31 }
  0xb3   :  { %2195 = vpow2.f32 %v1319_v6  ;;  %v2180_v23 = vpop.eup %2179 }
  0xb4   :  { %2197 = vtanh.f32 %v473_v8  ;;  %v2182_v24 = vpop.eup %2181 }
  0xb5   :  { %2199 = vrcp.f32 %v586_v13  ;;  %1918 = vmatpush3.bf16.msra.mxu0 %v1917_v17  ;;  %v2184_v27 = vpop.eup %2183  ;;  %v588_v28 = vadd.f32 1.0, %v2182_v24 }
  0xb6   :  { %2201 = vrcp.f32 %v587_v19  ;;  %1919 = vmatprep.subr.bf16.mxu0 %v2444_v0  ;;  %v2186_v35 = vpop.eup %2185  ;;  %v589_v36 = vadd.f32 1.0, %v2184_v27 }
  0xb7   :  { %2203 = vtanh.f32 %v474_v18  ;;  %v2188_v37 = vpop.eup %2187 }
  0xb8   :  { %2205 = vpow2.f32 %v1320_v21 }
  0xb9   :  { %2207 = vrcp.f32 %v588_v28  ;;  %1921 = vmatpush3.bf16.msra.mxu0 %v1920_v29 }
  0xba   :  { %v2190_v38 = vpop.eup %2189  ;;  %2209 = vtanh.f32 %v475_v30  ;;  %1922 = vmatprep.subr.bf16.mxu0 %v2444_v0 }
  0xbb   :  { %v2192_v41 = vpop.eup %2191  ;;  %v631_v42 = vmul.f32 %v2190_v38, %v2178_v16  ;;  %2211 = vpow2.f32 %v1321_v33 }
  0xbc   :  { %v2194_v34 = vpop.eup %2193  ;;  %v632_v44 = vmul.f32 %v2192_v41, %v2180_v23  ;;  %2213 = vrcp.f32 %v589_v36  ;;  %v886_v41 = vld [vmem:[#allocation5 + $0x108] sm:$0xff] }
  0xbd   :  { %v2196_v45 = vpop.eup %2195  ;;  %2215 = vtanh.f32 %v476_v39  ;;  %v633_v48 = vmul.f32 %v2194_v34, %v2186_v35  ;;  %1924 = vmatpush3.bf16.msra.mxu0 %v1923_v40  ;;  %v885_v40 = vld [vmem:[#allocation5 + $0x100] sm:$0xff]  ;;  %v1324_v43 = vmul.f32 -1.442695, %v886_v41  ;;  %v888_v34 = vld [vmem:[#allocation5 + $0x118] sm:$0xff] }
  0xbe   :  { %v2198_v46 = vpop.eup %2197  ;;  %v2603_v47 = vpack.c.bf16 %v632_v44, %v631_v42  ;;  %v590_v49 = vadd.f32 1.0, %v2196_v45  ;;  %1925 = vmatprep.subr.bf16.mxu0 %v2444_v0  ;;  %v1323_v42 = vmul.f32 -1.442695, %v885_v40  ;;  %v1325_v44 = vmul.f32 -1.442695, %v887_v9  ;;  %v875_v40 = vld [vmem:[#allocation2 + $0x138] sm:$0xff] }
  0xbf   :  { %v2200_v51 = vpop.eup %2199  ;;  %v1326_v45 = vmul.f32 -1.442695, %v888_v34 }
  0xc0   :  { %v2202_v52 = vpop.eup %2201  ;;  %1891 = vmatpush3.bf16.msra.mxu1 %v2603_v47  ;;  %v634_v53 = vmul.f32 %v2200_v51, %v2188_v37  ;;  %2217 = vrcp.f32 %v590_v49 }
  0xc1   :  { %v2204_v55 = vpop.eup %2203  ;;  %1892 = vmatprep.subr.bf16.mxu1 %v2444_v0  ;;  %v635_v59 = vmul.f32 %v2202_v52, %v2198_v46  ;;  %1927 = vmatpush3.bf16.msra.mxu0 %v1926_v50  ;;  %2219 = vtanh.f32 %v477_v56  ;;  %v889_v46 = vld [vmem:[#allocation5 + $0x120] sm:$0xff]  ;;  %v891_v50 = vld [vmem:[#allocation5 + $0x130] sm:$0xff] }
  0xc2   :  { %v2206_v57 = vpop.eup %2205  ;;  %v2608_v58 = vpack.c.bf16 %v634_v53, %v633_v48  ;;  %1952 = vmatprep.subr.bf16.mxu0 %v2444_v0  ;;  %v1327_v48 = vmul.f32 -1.442695, %v889_v46  ;;  %v1329_v52 = vmul.f32 -1.442695, %v891_v50  ;;  %v868_v56 = vld [vmem:[#allocation2 + $0x100] sm:$0xff] }
  0xc3   :  { %v2208_v60 = vpop.eup %2207  ;;  %v591_v62 = vadd.f32 1.0, %v2206_v57  ;;  %v869_v57 = vld [vmem:[#allocation2 + $0x108] sm:$0xff] }
  0xc4   :  { %v2210_v2 = vpop.eup %2209  ;;  %1894 = vmatpush3.bf16.msra.mxu1 %v2608_v58  ;;  %v636_v3 = vmul.f32 %v2208_v60, %v2204_v55 }
  0xc5   :  { %v2212_v4 = vpop.eup %2211  ;;  %1895 = vmatprep.subr.bf16.mxu1 %v2444_v0  ;;  %2221 = vrcp.f32 %v591_v62  ;;  %v870_v62 = vld [vmem:[#allocation2 + $0x110] sm:$0xff] }
  0xc6   :  { %v2214_v5 = vpop.eup %2213  ;;  %v1896_v6 = vpack.c.bf16 %v636_v3, %v635_v59  ;;  %2223 = vtanh.f32 %v478_v61  ;;  %v592_v7 = vadd.f32 1.0, %v2212_v4 }
  0xc7   :  { %v2216_v8 = vpop.eup %2215  ;;  %v637_v10 = vmul.f32 %v2214_v5, %v2210_v2  ;;  %v871_v2 = vld [vmem:[#allocation2 + $0x118] sm:$0xff] }
  0xc8   :  { %1897 = vmatpush3.bf16.msra.mxu1 %v1896_v6  ;;  %2225 = vrcp.f32 %v592_v7  ;;  %v872_v7 = vld [vmem:[#allocation2 + $0x120] sm:$0xff] }
  0xc9   :  { %1898 = vmatprep.subr.bf16.mxu1 %v2444_v0 }
  0xca   :  { %v2218_v11 = vpop.eup %2217 }
  0xcb   :  { %v638_v12 = vmul.f32 %v2218_v11, %v2216_v8  ;;  %v2220_v14 = vpop.eup %2219  ;;  %v873_v8 = vld [vmem:[#allocation2 + $0x128] sm:$0xff]  ;;  %v892_v11 = vld [vmem:[#allocation5 + $0x138] sm:$0xff] }
  0xcd   :  { %v1899_v13 = vpack.c.bf16 %v638_v12, %v637_v10 }
  0xcf   :  { %v2222_v15 = vpop.eup %2221  ;;  %1900 = vmatpush3.bf16.msra.mxu1 %v1899_v13 }
  0xd0   :  { %v2224_v16 = vpop.eup %2223  ;;  %1901 = vmatprep.subr.bf16.mxu1 %v2444_v0  ;;  %v639_v17 = vmul.f32 %v2222_v15, %v2220_v14  ;;  %v1330_v14 = vmul.f32 -1.442695, %v892_v11 }
  0xd2   :  { %v2226_v18 = vpop.eup %2225 }
  0xd3   :  { %v640_v19 = vmul.f32 %v2226_v18, %v2224_v16  ;;  %v893_v16 = vld [vmem:[#allocation5 + $0x140] sm:$0xff]  ;;  %v894_v18 = vld [vmem:[#allocation5 + $0x148] sm:$0xff] }
  0xd5   :  { %v1902_v20 = vpack.c.bf16 %v640_v19, %v639_v17 }
  0xd7   :  { %1903 = vmatpush3.bf16.msra.mxu1 %v1902_v20 }
  0xd8   :  { %1928 = vmatprep.subr.bf16.mxu1 %v2444_v0 }
 0x12c   :  { %v372_v21 = vpop.f32.mrb[0].mxu1 }
 0x12d   :  { %v1562_v23 = vpop.f32.mrb[1].mxu1  ;;  %v1305_v24 = vmul.f32 -1.442695, %v372_v21  ;;  %v902_v21 = vld [vmem:[#allocation7 + $0x100] sm:$0xff] }
 0x12e   :  { %v903_v23 = vld [vmem:[#allocation7 + $0x108] sm:$0xff] }
 0x12f   :  { %2227 = vpow2.f32 %v1305_v24  ;;  %v904_v24 = vld [vmem:[#allocation7 + $0x110] sm:$0xff] }
 0x139   :  { %v2228_v25 = vpop.eup %2227 }
 0x13a   :  { %v379_v26 = vadd.f32 1.0, %v2228_v25 }
 0x13c   :  { %2229 = vrcp.f32 %v379_v26 }
 0x146   :  { %v2230_v27 = vpop.eup %2229 }
 0x147   :  { %v459_v35 = vsub.f32 1.0, %v2230_v27 }
 0x157   :  { %v302_v28 = vpop.f32.mrb[0].mxu0 }
 0x158   :  { %v458_v29 = vmul.f32 %v2230_v27, %v302_v28  ;;  %v1527_v30 = vpop.f32.mrb[1].mxu0  ;;  %v1977_v27 = vpack.c.bf16 %v903_v23, %v902_v21  ;;  %v905_v28 = vld [vmem:[#allocation7 + $0x118] sm:$0xff]  ;;  %v912_v21 = vld [vmem:[#allocation7 + $0x150] sm:$0xff] }
 0x159   :  { %v1331_v30 = vmul.f32 -1.442695, %v893_v16  ;;  %v913_v23 = vld [vmem:[#allocation7 + $0x158] sm:$0xff] }
 0x177   :  { %v452_v31 = vpop.f32.mrb[2].mxu0 }
 0x178   :  { %v456_v32 = vmul.f32 1.442695, %v452_v31  ;;  %v1597_v33 = vpop.f32.mrb[3].mxu0 }
 0x179   :  { %v895_v33 = vld [vmem:[#allocation5 + $0x150] sm:$0xff] }
 0x17a   :  { %2231 = vpow2.f32 %v456_v32  ;;  %v1332_v32 = vmul.f32 -1.442695, %v894_v18  ;;  %v1333_v9 = vmul.f32 -1.442695, %v895_v33  ;;  %v881_v33 = vld [vmem:[#allocation2 + $0x168] sm:$0xff] }
 0x184   :  { %v2232_v36 = vpop.eup %2231 }
 0x185   :  { %v460_v37 = vmul.f32 %v2232_v36, %v459_v35 }
 0x187   :  { %v461_v38 = vadd.f32 %v460_v37, %v458_v29  ;;  %v874_v29 = vld [vmem:[#allocation2 + $0x130] sm:$0xff]  ;;  %v1980_v37 = vpack.c.bf16 %v905_v28, %v904_v24  ;;  %v915_v28 = vld [vmem:[#allocation7 + $0x168] sm:$0xff] }
 0x189   :  { %1631 = vmatmul.mubr.f32.vlgmr.msra.gmra.mrb[2].mxu1 %v461_v38  ;;  %1666 = vmatmul.mubr.f32.vlgmr.msra.gmra.mrb[4].mxu0 %v461_v38  ;;  %v787_v39 = vand.u32 2147483647, %v461_v38  ;;  %v896_v38 = vld [vmem:[#allocation5 + $0x158] sm:$0xff] }
 0x18a   :  { %1930 = vmatpush3.bf16.msra.mxu1 %v2588_v22  ;;  %1700 = vmatprep.mubr.msk.f32.mxu1 %vm2445_vm0, %v2446_v1 }
 0x18b   :  { %1931 = vmatprep.subr.bf16.mxu1 %v2444_v0  ;;  %1735 = vmatprep.mubr.msk.f32.mxu0 %vm2445_vm0, %v2446_v1  ;;  %v788_v22 = vadd.f32 1e-10, %v787_v39 }
 0x18d   :  { %2233 = vlog2.f32 %v788_v22 }
 0x18e   :  { %1933 = vmatpush3.bf16.msra.mxu1 %v2593_v54  ;;  %2235 = vpow2.f32 %v1323_v42 }
 0x18f   :  { %1934 = vmatprep.subr.bf16.mxu1 %v2444_v0  ;;  %2237 = vpow2.f32 %v1324_v43 }
 0x190   :  { %2239 = vpow2.f32 %v1325_v44  ;;  %v1334_v44 = vmul.f32 -1.442695, %v896_v38 }
 0x191   :  { %2241 = vpow2.f32 %v1326_v45  ;;  %v897_v45 = vld [vmem:[#allocation5 + $0x160] sm:$0xff] }
 0x192   :  { %1936 = vmatpush3.bf16.msra.mxu1 %v2597_v63  ;;  %2243 = vpow2.f32 %v1327_v48 }
 0x193   :  { %1937 = vmatprep.subr.bf16.mxu1 %v2444_v0 }
 0x196   :  { %1939 = vmatpush3.bf16.msra.mxu1 %v2603_v47  ;;  %v890_v47 = vld [vmem:[#allocation5 + $0x128] sm:$0xff] }
 0x197   :  { %1940 = vmatprep.subr.bf16.mxu1 %v2444_v0  ;;  %v2234_v54 = vpop.eup %2233  ;;  %v1328_v49 = vmul.f32 -1.442695, %v890_v47 }
 0x198   :  { %v790_v63 = vmul.f32 0.6931472, %v2234_v54  ;;  %v2236_v51 = vpop.eup %2235  ;;  %v906_v54 = vld [vmem:[#allocation7 + $0x120] sm:$0xff] }
 0x199   :  { %2245 = vpow2.f32 %v1328_v49  ;;  %v2238_v53 = vpop.eup %2237  ;;  %v982_v55 = vadd.f32 1.0, %v2236_v51  ;;  %v898_v49 = vld [vmem:[#allocation5 + $0x168] sm:$0xff] }
 0x19a   :  { %1942 = vmatpush3.bf16.msra.mxu1 %v2608_v58  ;;  %v983_v58 = vadd.f32 1.0, %v2238_v53  ;;  %2247 = vpow2.f32 %v1329_v52  ;;  %v2240_v59 = vpop.eup %2239  ;;  %v908_v52 = vld [vmem:[#allocation7 + $0x130] sm:$0xff]  ;;  %v909_v53 = vld [vmem:[#allocation7 + $0x138] sm:$0xff] }
 0x19b   :  { %1943 = vmatprep.subr.bf16.mxu1 %v2444_v0  ;;  %2249 = vtanh.f32 %v868_v56  ;;  %v2242_v60 = vpop.eup %2241  ;;  %v984_v61 = vadd.f32 1.0, %v2240_v59 }
 0x19c   :  { %2251 = vtanh.f32 %v869_v57  ;;  %v985_v3 = vadd.f32 1.0, %v2242_v60  ;;  %v2244_v4 = vpop.eup %2243  ;;  %v877_v57 = vld [vmem:[#allocation2 + $0x148] sm:$0xff] }
 0x19d   :  { %2253 = vrcp.f32 %v982_v55  ;;  %v876_v55 = vld [vmem:[#allocation2 + $0x140] sm:$0xff] }
 0x19e   :  { %1945 = vmatpush3.bf16.msra.mxu1 %v1896_v6  ;;  %2255 = vrcp.f32 %v983_v58  ;;  %v986_v6 = vadd.f32 1.0, %v2244_v4  ;;  %v1335_v58 = vmul.f32 -1.442695, %v897_v45  ;;  %v899_v4 = vld [vmem:[#allocation5 + $0x170] sm:$0xff] }
 0x19f   :  { %1946 = vmatprep.subr.bf16.mxu1 %v2444_v0  ;;  %2257 = vtanh.f32 %v870_v62  ;;  %v1336_v62 = vmul.f32 -1.442695, %v898_v49 }
 0x1a0   :  { %2259 = vtanh.f32 %v871_v2 }
 0x1a1   :  { %2261 = vrcp.f32 %v984_v61  ;;  %v1986_v61 = vpack.c.bf16 %v909_v53, %v908_v52 }
 0x1a2   :  { %1948 = vmatpush3.bf16.msra.mxu1 %v1899_v13  ;;  %2263 = vrcp.f32 %v985_v3  ;;  %v878_v3 = vld [vmem:[#allocation2 + $0x150] sm:$0xff] }
 0x1a3   :  { %1949 = vmatprep.subr.bf16.mxu1 %v2444_v0  ;;  %v2246_v5 = vpop.eup %2245  ;;  %2265 = vtanh.f32 %v872_v7  ;;  %v900_v7 = vld [vmem:[#allocation5 + $0x178] sm:$0xff] }
 0x1a4   :  { %v987_v10 = vadd.f32 1.0, %v2246_v5  ;;  %v2248_v12 = vpop.eup %2247  ;;  %2267 = vtanh.f32 %v873_v8  ;;  %v1338_v18 = vmul.f32 -1.442695, %v900_v7 }
 0x1a5   :  { %v2250_v13 = vpop.eup %2249  ;;  %2269 = vrcp.f32 %v986_v6  ;;  %v988_v41 = vadd.f32 1.0, %v2248_v12  ;;  %v879_v6 = vld [vmem:[#allocation2 + $0x158] sm:$0xff]  ;;  %v910_v12 = vld [vmem:[#allocation7 + $0x140] sm:$0xff] }
 0x1a6   :  { %1951 = vmatpush3.bf16.msra.mxu1 %v1902_v20  ;;  %v2252_v15 = vpop.eup %2251  ;;  %2271 = vrcp.f32 %v987_v10 }
 0x1a7   :  { %1976 = vmatprep.subr.bf16.mxu1 %v2444_v0  ;;  %v2254_v17 = vpop.eup %2253  ;;  %2273 = vpow2.f32 %v1330_v14  ;;  %v1337_v14 = vmul.f32 -1.442695, %v899_v4 }
 0x1a8   :  { %v2256_v19 = vpop.eup %2255  ;;  %v1030_v20 = vmul.f32 %v2254_v17, %v2250_v13  ;;  %2275 = vtanh.f32 %v874_v29  ;;  %v911_v13 = vld [vmem:[#allocation7 + $0x148] sm:$0xff] }
 0x1a9   :  { %1701 = vmatmul.mubr.f32.vlgmr.msra.gmra.mrb[4].mxu1 %v790_v63  ;;  %v2258_v25 = vpop.eup %2257  ;;  %v1031_v26 = vmul.f32 %v2256_v19, %v2252_v15  ;;  %v907_v63 = vld [vmem:[#allocation7 + $0x128] sm:$0xff]  ;;  %2277 = vpow2.f32 %v1331_v30  ;;  %v1989_v17 = vpack.c.bf16 %v911_v13, %v910_v12 }
 0x1aa   :  { %1770 = vmatprep.mubr.msk.f32.mxu1 %vm2445_vm0, %v2446_v1  ;;  %v2260_v31 = vpop.eup %2259  ;;  %1978 = vmatpush3.bf16.msra.mxu1 %v1977_v27  ;;  %2279 = vpow2.f32 %v1332_v32  ;;  %v1983_v48 = vpack.c.bf16 %v907_v63, %v906_v54  ;;  %v914_v27 = vld [vmem:[#allocation7 + $0x160] sm:$0xff]  ;;  %v916_v54 = vld [vmem:[#allocation7 + $0x170] sm:$0xff]  ;;  %v917_v63 = vld [vmem:[#allocation7 + $0x178] sm:$0xff] }
 0x1ab   :  { %v2262_v35 = vpop.eup %2261  ;;  %v2635_v36 = vpack.c.bf16 %v1031_v26, %v1030_v20  ;;  %1979 = vmatprep.subr.bf16.mxu1 %v2444_v0  ;;  %2281 = vtanh.f32 %v875_v40  ;;  %v1992_v26 = vpack.c.bf16 %v913_v23, %v912_v21  ;;  %v1995_v38 = vpack.c.bf16 %v915_v28, %v914_v27 }
 0x1ac   :  { %v2264_v39 = vpop.eup %2263  ;;  %v1032_v22 = vmul.f32 %v2262_v35, %v2258_v25  ;;  %2283 = vrcp.f32 %v988_v41 }
 0x1ad   :  { %v2266_v42 = vpop.eup %2265  ;;  %1954 = vmatpush3.bf16.msra.mxu0 %v2635_v36  ;;  %v1033_v43 = vmul.f32 %v2264_v39, %v2260_v31  ;;  %2285 = vpow2.f32 %v1333_v9  ;;  %v880_v31 = vld [vmem:[#allocation2 + $0x160] sm:$0xff] }
 0x1ae   :  { %v2268_v34 = vpop.eup %2267  ;;  %1955 = vmatprep.subr.bf16.mxu0 %v2444_v0  ;;  %1981 = vmatpush3.bf16.msra.mxu1 %v1980_v37  ;;  %2287 = vpow2.f32 %v1334_v44  ;;  %v1998_v44 = vpack.c.bf16 %v917_v63, %v916_v54 }
 0x1af   :  { %v2270_v46 = vpop.eup %2269  ;;  %v2640_v47 = vpack.c.bf16 %v1033_v43, %v1032_v22  ;;  %1982 = vmatprep.subr.bf16.mxu1 %v2444_v0  ;;  %2289 = vtanh.f32 %v876_v55 }
 0x1b0   :  { %v2272_v50 = vpop.eup %2271  ;;  %v1034_v51 = vmul.f32 %v2270_v46, %v2266_v42  ;;  %2291 = vtanh.f32 %v877_v57  ;;  %v882_v46 = vld [vmem:[#allocation2 + $0x170] sm:$0xff] }
 0x1b1   :  { %1957 = vmatpush3.bf16.msra.mxu0 %v2640_v47  ;;  %v1035_v56 = vmul.f32 %v2272_v50, %v2268_v34  ;;  %v2274_v59 = vpop.eup %2273  ;;  %2293 = vpow2.f32 %v1335_v58  ;;  %v883_v50 = vld [vmem:[#allocation2 + $0x178] sm:$0xff] }
 0x1b2   :  { %1958 = vmatprep.subr.bf16.mxu0 %v2444_v0  ;;  %1984 = vmatpush3.bf16.msra.mxu1 %v1983_v48  ;;  %v989_v2 = vadd.f32 1.0, %v2274_v59  ;;  %v2276_v5 = vpop.eup %2275 }
 0x1b3   :  { %v2645_v60 = vpack.c.bf16 %v1035_v56, %v1034_v51  ;;  %1985 = vmatprep.subr.bf16.mxu1 %v2444_v0  ;;  %v2278_v8 = vpop.eup %2277 }
 0x1b4   :  { %2295 = vrcp.f32 %v989_v2  ;;  %v2280_v10 = vpop.eup %2279  ;;  %v990_v11 = vadd.f32 1.0, %v2278_v8 }
 0x1b5   :  { %1960 = vmatpush3.bf16.msra.mxu0 %v2645_v60  ;;  %2297 = vpow2.f32 %v1336_v62  ;;  %v2282_v15 = vpop.eup %2281  ;;  %v991_v16 = vadd.f32 1.0, %v2280_v10 }
 0x1b6   :  { %1961 = vmatprep.subr.bf16.mxu0 %v2444_v0  ;;  %1987 = vmatpush3.bf16.msra.mxu1 %v1986_v61  ;;  %2299 = vtanh.f32 %v878_v3  ;;  %v2284_v19 = vpop.eup %2283 }
 0x1b7   :  { %1988 = vmatprep.subr.bf16.mxu1 %v2444_v0  ;;  %2301 = vtanh.f32 %v879_v6  ;;  %v2286_v20 = vpop.eup %2285  ;;  %v1036_v37 = vmul.f32 %v2284_v19, %v2276_v5 }
 0x1b8   :  { %2303 = vrcp.f32 %v990_v11  ;;  %v2288_v24 = vpop.eup %2287  ;;  %v992_v25 = vadd.f32 1.0, %v2286_v20 }
 0x1b9   :  { %2305 = vrcp.f32 %v991_v16  ;;  %v2290_v29 = vpop.eup %2289  ;;  %v993_v30 = vadd.f32 1.0, %v2288_v24 }
 0x1ba   :  { %1990 = vmatpush3.bf16.msra.mxu1 %v1989_v17  ;;  %2307 = vpow2.f32 %v1337_v14  ;;  %v2292_v32 = vpop.eup %2291 }
 0x1bb   :  { %1991 = vmatprep.subr.bf16.mxu1 %v2444_v0  ;;  %2309 = vpow2.f32 %v1338_v18  ;;  %v2294_v35 = vpop.eup %2293 }
 0x1bc   :  { %2311 = vrcp.f32 %v992_v25  ;;  %v994_v22 = vadd.f32 1.0, %v2294_v35 }
 0x1bd   :  { %2313 = vrcp.f32 %v993_v30 }
 0x1be   :  { %1993 = vmatpush3.bf16.msra.mxu1 %v1992_v26  ;;  %v2296_v39 = vpop.eup %2295  ;;  %2315 = vtanh.f32 %v880_v31 }
 0x1bf   :  { %1994 = vmatprep.subr.bf16.mxu1 %v2444_v0  ;;  %v2298_v40 = vpop.eup %2297  ;;  %v1037_v41 = vmul.f32 %v2296_v39, %v2282_v15  ;;  %2317 = vtanh.f32 %v881_v33 }
 0x1c0   :  { %v2300_v42 = vpop.eup %2299  ;;  %v995_v43 = vadd.f32 1.0, %v2298_v40  ;;  %2319 = vrcp.f32 %v994_v22 }
 0x1c1   :  { %v2302_v9 = vpop.eup %2301  ;;  %v2653_v34 = vpack.c.bf16 %v1037_v41, %v1036_v37 }
 0x1c2   :  { %1996 = vmatpush3.bf16.msra.mxu1 %v1995_v38  ;;  %v2304_v45 = vpop.eup %2303  ;;  %2321 = vrcp.f32 %v995_v43 }
 0x1c3   :  { %1997 = vmatprep.subr.bf16.mxu1 %v2444_v0  ;;  %v2306_v48 = vpop.eup %2305  ;;  %1963 = vmatpush3.bf16.msra.mxu0 %v2653_v34  ;;  %v1038_v49 = vmul.f32 %v2304_v45, %v2290_v29  ;;  %2323 = vtanh.f32 %v882_v46 }
 0x1c4   :  { %v2308_v51 = vpop.eup %2307  ;;  %1964 = vmatprep.subr.bf16.mxu0 %v2444_v0  ;;  %v1039_v52 = vmul.f32 %v2306_v48, %v2292_v32  ;;  %2325 = vtanh.f32 %v883_v50 }
 0x1c5   :  { %v2310_v53 = vpop.eup %2309  ;;  %v996_v55 = vadd.f32 1.0, %v2308_v51 }
 0x1c6   :  { %1999 = vmatpush3.bf16.msra.mxu1 %v1998_v44  ;;  %v2312_v56 = vpop.eup %2311  ;;  %v1965_v57 = vpack.c.bf16 %v1039_v52, %v1038_v49  ;;  %v997_v58 = vadd.f32 1.0, %v2310_v53 }
 0x1c7   :  { %v2314_v59 = vpop.eup %2313  ;;  %v1040_v61 = vmul.f32 %v2312_v56, %v2300_v42  ;;  %2327 = vrcp.f32 %v996_v55 }
 0x1c8   :  { %v2316_v62 = vpop.eup %2315  ;;  %1966 = vmatpush3.bf16.msra.mxu0 %v1965_v57  ;;  %v1041_v2 = vmul.f32 %v2314_v59, %v2302_v9  ;;  %2329 = vrcp.f32 %v997_v58 }
 0x1c9   :  { %v2318_v3 = vpop.eup %2317  ;;  %1967 = vmatprep.subr.bf16.mxu0 %v2444_v0 }
 0x1ca   :  { %v2320_v4 = vpop.eup %2319  ;;  %v1968_v5 = vpack.c.bf16 %v1041_v2, %v1040_v61 }
 0x1cb   :  { %v1042_v6 = vmul.f32 %v2320_v4, %v2316_v62 }
 0x1cc   :  { %v2322_v7 = vpop.eup %2321  ;;  %1969 = vmatpush3.bf16.msra.mxu0 %v1968_v5 }
 0x1cd   :  { %1970 = vmatprep.subr.bf16.mxu0 %v2444_v0  ;;  %v1043_v8 = vmul.f32 %v2322_v7, %v2318_v3  ;;  %v2324_v10 = vpop.eup %2323 }
 0x1ce   :  { %v2326_v12 = vpop.eup %2325 }
 0x1cf   :  { %v1971_v11 = vpack.c.bf16 %v1043_v8, %v1042_v6 }
 0x1d1   :  { %v2328_v13 = vpop.eup %2327  ;;  %1972 = vmatpush3.bf16.msra.mxu0 %v1971_v11 }
 0x1d2   :  { %v2330_v14 = vpop.eup %2329  ;;  %1973 = vmatprep.subr.bf16.mxu0 %v2444_v0  ;;  %v1044_v15 = vmul.f32 %v2328_v13, %v2324_v10 }
 0x1d3   :  { %v1045_v16 = vmul.f32 %v2330_v14, %v2326_v12 }
 0x1d5   :  { %v1974_v17 = vpack.c.bf16 %v1045_v16, %v1044_v15 }
 0x1d7   :  { %1975 = vmatpush3.bf16.msra.mxu0 %v1974_v17 }
 0x1d8   :  { %2000 = vmatprep.subr.bf16.mxu0 %v2444_v0 }
 0x25c   :  { %v707_v18 = vpop.f32.mrb[2].mxu1  ;;  %v777_v19 = vpop.f32.mrb[4].mxu0 }
 0x25d   :  { %v1322_v20 = vmul.f32 -1.442695, %v777_v19  ;;  %v1632_v21 = vpop.f32.mrb[3].mxu1  ;;  %v1667_v23 = vpop.f32.mrb[5].mxu0 }
 0x25f   :  { %2331 = vpow2.f32 %v1322_v20 }
 0x269   :  { %v2332_v24 = vpop.eup %2331 }
 0x26a   :  { %v784_v25 = vadd.f32 1.0, %v2332_v24 }
 0x26c   :  { %2333 = vrcp.f32 %v784_v25 }
 0x276   :  { %v2334_v26 = vpop.eup %2333 }
 0x277   :  { %v863_v27 = vmul.f32 %v2334_v26, %v707_v18  ;;  %v864_v31 = vsub.f32 1.0, %v2334_v26 }
 0x27c   :  { %v857_v28 = vpop.f32.mrb[4].mxu1 }
 0x27d   :  { %v861_v29 = vmul.f32 1.442695, %v857_v28  ;;  %v1702_v30 = vpop.f32.mrb[5].mxu1 }
 0x27f   :  { %2335 = vpow2.f32 %v861_v29 }
 0x289   :  { %v2336_v32 = vpop.eup %2335 }
 0x28a   :  { %v865_v33 = vmul.f32 %v2336_v32, %v864_v31 }
 0x28c   :  { %v866_v35 = vadd.f32 %v865_v33, %v863_v27 }
 0x28e   :  { %1736 = vmatmul.mubr.f32.vlgmr.msra.gmra.mrb[6].mxu0 %v866_v35  ;;  %1771 = vmatmul.mubr.f32.vlgmr.msra.gmra.mrb[6].mxu1 %v866_v35  ;;  %v1192_v37 = vand.u32 2147483647, %v866_v35 }
 0x28f   :  { %2002 = vmatpush3.bf16.msra.mxu0 %v2635_v36  ;;  %1805 = vmatprep.mubr.msk.f32.mxu0 %vm2445_vm0, %v2446_v1 }
 0x290   :  { %2003 = vmatprep.subr.bf16.mxu0 %v2444_v0  ;;  %v1193_v38 = vadd.f32 1e-10, %v1192_v37 }
 0x292   :  { %2337 = vlog2.f32 %v1193_v38 }
 0x293   :  { %2005 = vmatpush3.bf16.msra.mxu0 %v2640_v47 }
 0x294   :  { %2006 = vmatprep.subr.bf16.mxu0 %v2444_v0 }
 0x297   :  { %2008 = vmatpush3.bf16.msra.mxu0 %v2645_v60 }
 0x298   :  { %2009 = vmatprep.subr.bf16.mxu0 %v2444_v0 }
 0x29b   :  { %2011 = vmatpush3.bf16.msra.mxu0 %v2653_v34 }
 0x29c   :  { %2012 = vmatprep.subr.bf16.mxu0 %v2444_v0  ;;  %v2338_v1 = vpop.eup %2337 }
 0x29d   :  { %v1195_v36 = vmul.f32 0.6931472, %v2338_v1 }
 0x29f   :  { %2014 = vmatpush3.bf16.msra.mxu0 %v1965_v57 }
 0x2a0   :  { %2015 = vmatprep.subr.bf16.mxu0 %v2444_v0 }
 0x2a3   :  { %2017 = vmatpush3.bf16.msra.mxu0 %v1968_v5 }
 0x2a4   :  { %2018 = vmatprep.subr.bf16.mxu0 %v2444_v0 }
 0x2a7   :  { %2020 = vmatpush3.bf16.msra.mxu0 %v1971_v11 }
 0x2a8   :  { %2021 = vmatprep.subr.bf16.mxu0 %v2444_v0 }
 0x2ab   :  { %2023 = vmatpush3.bf16.msra.mxu0 %v1974_v17 }
 0x2ae   :  { %1806 = vmatmul.mubr.f32.vlgmr.msra.gmra.mrb[8].mxu0 %v1195_v36 }
 0x361   :  { %v1112_v47 = vpop.f32.mrb[6].mxu0  ;;  %v1182_v60 = vpop.f32.mrb[6].mxu1 }
 0x362   :  { %v1339_v39 = vmul.f32 -1.442695, %v1182_v60  ;;  %v1737_v22 = vpop.f32.mrb[7].mxu0  ;;  %v1772_v54 = vpop.f32.mrb[7].mxu1 }
 0x364   :  { %2339 = vpow2.f32 %v1339_v39 }
 0x36e   :  { %v2340_v63 = vpop.eup %2339 }
 0x36f   :  { %v1189_v40 = vadd.f32 1.0, %v2340_v63 }
 0x371   :  { %2341 = vrcp.f32 %v1189_v40 }
 0x37b   :  { %v2342_v41 = vpop.eup %2341 }
 0x37c   :  { %v1268_v42 = vmul.f32 %v2342_v41, %v1112_v47  ;;  %v1269_v0 = vsub.f32 1.0, %v2342_v41 }
 0x381   :  { %v1262_v43 = vpop.f32.mrb[8].mxu0 }
 0x382   :  { %v1266_v9 = vmul.f32 1.442695, %v1262_v43  ;;  %v1807_v34 = vpop.f32.mrb[9].mxu0 }
 0x384   :  { %2343 = vpow2.f32 %v1266_v9 }
 0x38e   :  { %v2344_v44 = vpop.eup %2343 }
 0x38f   :  { %v1270_v45 = vmul.f32 %v2344_v44, %v1269_v0 }
 0x391   :  { %v1271_v46 = vadd.f32 %v1270_v45, %v1268_v42 }
 0x393   :  { %1272 = vst [vmem:[#allocation8] sm:$0xff] %v1271_v46 }
 0x394   :  { %2422 = shalt.err (!%p2419_p0)
}
 0x395   :  { %s2423_s30 = scalar_lea.hbm %s2691_s4, 128 }
 0x396   :  { %p2424_p1 = scmp.ne.s32.totalorder %s2691_s4, %s2423_s30  ;;  %p2427_p2 = scmp.lt.u32.totalorder %s2423_s30, %s2691_s4 }
 0x398   :  { %p2429_p3 = pnand %p2427_p2, %p2424_p1 }
 0x39a   :  { %2432 = shalt.err (!%p2429_p3)
}
 0x39b   :  { %1282 = dma.vmem_to_hbm [thread:$0]  %s1280_s26, 128, %s2691_s4, [#allocation4]  }
 0x39c   :  { %2437 = dma.done.wait [#allocation4], 128  }
 0x39d   :  { %2438 = vsyncadd [#allocation4], 4294967168 }
 0x39e   :  { %1286 = vsyncpa [#allocation3], 1 }
 0x39f   :  { %1287 = vsyncpa [#allocation6], 1 }
 0x3a0   :  { %1288 = vsyncpa [#allocation4], 1 }

</bundles_post_ra>
